<compile_context>
chip_gen: v5e
topology: v5e:2x2
jax: 0.10.0
libtpu: 0.0.40
codegen_flags: <defaults>
</compile_context>

<pallas_src>
import functools

import jax
import jax.numpy as jnp
from jax.experimental import pallas as pl
from jax.experimental.pallas import tpu as pltpu


# ----------------------------------------------------------------------------
# Pallas kernel: one (direction, time-chunk) step of a bidirectional LSTM layer.
# ----------------------------------------------------------------------------
def _bilstm_layer_kernel(gx_ref, w_hh_ref, out_ref, h_fin_ref, c_fin_ref,
                         h_scr, c_scr, *, n_hidden, t_chunk):
    """Refs:
      gx_ref:    (1, Tc, B, 4H)  precomputed x_t @ W_ih^T + bias (this dir/chunk)
      w_hh_ref:  (1, H, 4H)      recurrent weight (transposed) for this direction
      out_ref:   (1, Tc, B, H)   per-timestep hidden outputs (natural time order)
      h_fin_ref: (1, B, H)       final hidden state of this direction (resident)
      c_fin_ref: (1, B, H)       final cell state of this direction (resident)
      h_scr/c_scr: (B, H)        recurrent state carried across time chunks

    Gate order along the 4H axis is [i, f, o, g] (pre-permuted on the host).
    """
    d = pl.program_id(0)            # 0 = forward, 1 = backward
    tc = pl.program_id(1)
    n_tc = pl.num_programs(1)
    H = n_hidden

    @pl.when(tc == 0)
    def _init():
        h_scr[...] = jnp.zeros_like(h_scr)
        c_scr[...] = jnp.zeros_like(c_scr)

    w_hh = w_hh_ref[0]              # (H, 4H); hoisted out of the time loop

    def step(s, carry):
        h_prev, c_prev = carry
        # forward: rows 0..Tc-1; backward: rows Tc-1..0 (the chunk itself is
        # already selected in reverse order by the index_map).
        local = s + d * (t_chunk - 1 - 2 * s)
        gates = gx_ref[0, local] + jnp.dot(h_prev, w_hh,
                                           preferred_element_type=jnp.float32)
        # [i, f, o] share one contiguous sigmoid; g gets one tanh.
        sig = jax.nn.sigmoid(gates[:, :3 * H])
        g_g = jnp.tanh(gates[:, 3 * H:])
        i_g = sig[:, 0 * H:1 * H]
        f_g = sig[:, 1 * H:2 * H]
        o_g = sig[:, 2 * H:3 * H]
        c_t = f_g * c_prev + i_g * g_g
        h_t = o_g * jnp.tanh(c_t)
        out_ref[0, local] = h_t
        return h_t, c_t

    unroll = True if t_chunk <= 16 else 4
    h_last, c_last = jax.lax.fori_loop(0, t_chunk, step,
                                       (h_scr[...], c_scr[...]), unroll=unroll)
    h_scr[...] = h_last
    c_scr[...] = c_last

    @pl.when(tc == n_tc - 1)
    def _finalize():
        h_fin_ref[0] = h_last
        c_fin_ref[0] = c_last


def _pick_chunk(t, b, g, cap=128, budget_bytes=4 << 20):
    """Largest divisor of t not exceeding cap, with the per-chunk gate slab
    (Tc * B * 4H * 4 bytes) kept under a modest VMEM budget (double-buffered
    by the pipeline)."""
    per_step = max(1, b * g * 4)
    cap = max(1, min(cap, t, budget_bytes // per_step))
    best = 1
    for c in range(1, cap + 1):
        if t % c == 0:
            best = c
    return best


def bilstm_layer(gx, w_hh_t, t_chunk):
    """Run one bidirectional LSTM layer.

    gx:      (2, T, B, 4H)  precomputed gate inputs (bias folded in) per direction
    w_hh_t:  (2, H, 4H)     transposed recurrent weights per direction

    Returns (out, h_fin, c_fin):
      out   (2, T, B, H)  per-direction hidden sequences (natural time order)
      h_fin (2, B, H)     final hidden states  [fwd, bwd]
      c_fin (2, B, H)     final cell states    [fwd, bwd]
    """
    n_dir, T, B, G = gx.shape
    H = G // 4
    assert n_dir == 2 and T % t_chunk == 0
    n_chunks = T // t_chunk

    kernel = functools.partial(_bilstm_layer_kernel, n_hidden=H, t_chunk=t_chunk)

    def time_map(d, tc):
        # forward walks chunks 0..nc-1; backward walks nc-1..0.  Reversal lives
        # entirely in the index_map -- no data reversal in HBM.
        return (d, tc + d * (n_chunks - 1 - 2 * tc), 0, 0)

    out, h_fin, c_fin = pl.pallas_call(
        kernel,
        out_shape=(
            jax.ShapeDtypeStruct((2, T, B, H), jnp.float32),
            jax.ShapeDtypeStruct((2, B, H), jnp.float32),
            jax.ShapeDtypeStruct((2, B, H), jnp.float32),
        ),
        grid_spec=pltpu.PrefetchScalarGridSpec(
            num_scalar_prefetch=0,
            grid=(2, n_chunks),                              # (direction, time chunk)
            in_specs=[
                pl.BlockSpec((1, t_chunk, B, G), time_map),  # gate inputs
                pl.BlockSpec((1, H, G), lambda d, tc: (d, 0, 0)),   # W_hh^T
            ],
            out_specs=[
                pl.BlockSpec((1, t_chunk, B, H), time_map),  # hidden sequence
                pl.BlockSpec((1, B, H), lambda d, tc: (d, 0, 0)),   # final h (resident)
                pl.BlockSpec((1, B, H), lambda d, tc: (d, 0, 0)),   # final c (resident)
            ],
            scratch_shapes=[
                pltpu.VMEM((B, H), jnp.float32),             # h state
                pltpu.VMEM((B, H), jnp.float32),             # c state
            ],
        ),
        compiler_params=pltpu.CompilerParams(
            # direction axis is independent (parallel across TensorCores);
            # time axis is a sequential recurrence.
            dimension_semantics=("parallel", "arbitrary"),
        ),
    )(gx, w_hh_t)
    return out, h_fin, c_fin


# ----------------------------------------------------------------------------
# Encoder forward (glue in plain JAX around the Pallas LSTM kernel).
# ----------------------------------------------------------------------------
def encoder_forward(tokens, kparams, pad_idx=0, t_chunk=None):
    """tokens: (T, B) int32.  kparams: output of prepare_params().
    Returns (output, (h_n, c_n)) like nn.LSTM."""
    del pad_idx  # pad row of the embedding table is already zero
    # Embedding lookup (gather) stays in XLA glue.
    # TODO(synk): for production vocab sizes, replace with a scalar-prefetch
    # Pallas row-gather fused with the layer-0 input projection.
    emb = jnp.take(kparams["embed"], tokens, axis=0)         # (T, B, E)
    T, B = emb.shape[0], emb.shape[1]
    # embed_dropout has p=0 -> identity.

    G = kparams["lstm"][0]["w_hh_t"].shape[-1]               # 4H
    t_chunk = t_chunk or _pick_chunk(T, B, G)

    x_dirs = None                                            # (2, T, B, H) per-direction
    h_list, c_list = [], []
    for l, layer in enumerate(kparams["lstm"]):
        # Input projection hoisted out of the recurrence: one large matmul for
        # all timesteps and both directions, bias folded in.
        if l == 0:
            gx = jnp.einsum("tbe,deg->dtbg", emb, layer["w_ih_t"]) + layer["b"]
        else:
            # Consume the previous layer's per-direction outputs directly
            # (contraction over prev-direction axis == implicit concat).
            gx = jnp.einsum("ptbh,dphg->dtbg", x_dirs, layer["w_ih_t"]) + layer["b"]
        x_dirs, h_fin, c_fin = bilstm_layer(gx, layer["w_hh_t"], t_chunk)
        h_list.append(h_fin)                                 # (2, B, H) [fwd, bwd]
        c_list.append(c_fin)

    output_padded = jnp.concatenate([x_dirs[0], x_dirs[1]], axis=-1)   # (T, B, 2H)
    h_n = jnp.concatenate(h_list, axis=0)                    # (n_layers*2, B, H)
    c_n = jnp.concatenate(c_list, axis=0)
    return output_padded, (h_n, c_n)

# TODO(synk): the `lens is not None` branch (pack_padded_sequence /
# pad_packed_sequence), detach_mask / tmp_emb_for_update autograd tricks and
# the one-hot (3-D data) input path have no clean forward-only Pallas
# equivalent; only the lens=None, integer-token path is implemented.


# ----------------------------------------------------------------------------
# Parameter construction (PyTorch-native layout) + kernel-layout preparation.
# ----------------------------------------------------------------------------
def make_params(key, vocab_size, n_embed, n_hidden, n_layers, pad_idx):
    """PyTorch-layout parameters: per layer/direction w_ih (4H, in),
    w_hh (4H, H), b_ih (4H,), b_hh (4H,), gate order [i, f, g, o]."""
    keys = jax.random.split(key, 1 + n_layers * 2 * 4)
    k_iter = iter(keys)

    embed_w = 0.1 * jax.random.normal(next(k_iter), (vocab_size, n_embed), jnp.float32)
    embed_w = embed_w.at[pad_idx].set(0.0)          # nn.Embedding padding_idx row = 0

    scale = 1.0 / jnp.sqrt(jnp.float32(n_hidden))   # PyTorch LSTM init range
    lstm_params = []
    for l in range(n_layers):
        in_size = n_embed if l == 0 else 2 * n_hidden
        w_ihs, w_hhs, b_ihs, b_hhs = [], [], [], []
        for _d in range(2):
            w_ihs.append(jax.random.uniform(next(k_iter), (4 * n_hidden, in_size),
                                            jnp.float32, -scale, scale))
            w_hhs.append(jax.random.uniform(next(k_iter), (4 * n_hidden, n_hidden),
                                            jnp.float32, -scale, scale))
            b_ihs.append(jax.random.uniform(next(k_iter), (4 * n_hidden,),
                                            jnp.float32, -scale, scale))
            b_hhs.append(jax.random.uniform(next(k_iter), (4 * n_hidden,),
                                            jnp.float32, -scale, scale))
        lstm_params.append({
            "w_ih": jnp.stack(w_ihs, axis=0),       # (2, 4H, in_size)
            "w_hh": jnp.stack(w_hhs, axis=0),       # (2, 4H, H)
            "b_ih": jnp.stack(b_ihs, axis=0),       # (2, 4H)
            "b_hh": jnp.stack(b_hhs, axis=0),       # (2, 4H)
        })
    return {"embed": embed_w, "lstm": lstm_params}


def _ifgo_to_ifog(x, axis):
    """Permute the 4H gate axis from PyTorch [i, f, g, o] to kernel [i, f, o, g]."""
    i, f, g, o = jnp.split(x, 4, axis=axis)
    return jnp.concatenate([i, f, o, g], axis=axis)


def prepare_params(params):
    """Convert PyTorch-layout params into the kernel layout (one-time, host):
    gate rows permuted to [i, f, o, g], weights transposed, biases folded."""
    n_hidden = params["lstm"][0]["w_hh"].shape[-1]
    layers = []
    for l, layer in enumerate(params["lstm"]):
        w_ih = _ifgo_to_ifog(layer["w_ih"], axis=-2)          # (2, 4H, in)
        w_hh = _ifgo_to_ifog(layer["w_hh"], axis=-2)          # (2, 4H, H)
        b = _ifgo_to_ifog(layer["b_ih"] + layer["b_hh"], axis=-1)   # (2, 4H)
        w_ih_t = jnp.swapaxes(w_ih, -1, -2)                   # (2, in, 4H)
        if l > 0:
            # Split 2H input features per previous-layer direction so layers can
            # chain without an explicit concatenate.
            w_ih_t = w_ih_t.reshape(2, 2, n_hidden, 4 * n_hidden)
        layers.append({
            "w_ih_t": w_ih_t,
            "w_hh_t": jnp.swapaxes(w_hh, -1, -2),             # (2, H, 4H)
            "b": b.reshape(2, 1, 1, 4 * n_hidden),
        })
    return {"embed": params["embed"], "lstm": layers}


# ----------------------------------------------------------------------------
# Pure-JAX reference (PyTorch semantics, gate order [i, f, g, o]).
# ----------------------------------------------------------------------------
def _lstm_ref_dir(x, w_ih, w_hh, b, reverse):
    H = w_hh.shape[-1]
    xs = x[::-1] if reverse else x
    w_ih_t, w_hh_t = w_ih.T, w_hh.T

    def step(carry, x_t):
        h, c = carry
        g = x_t @ w_ih_t + h @ w_hh_t + b
        i = jax.nn.sigmoid(g[:, 0 * H:1 * H])
        f = jax.nn.sigmoid(g[:, 1 * H:2 * H])
        gg = jnp.tanh(g[:, 2 * H:3 * H])
        o = jax.nn.sigmoid(g[:, 3 * H:4 * H])
        c = f * c + i * gg
        h = o * jnp.tanh(c)
        return (h, c), h

    B = x.shape[1]
    init = (jnp.zeros((B, H), jnp.float32), jnp.zeros((B, H), jnp.float32))
    (h_f, c_f), ys = jax.lax.scan(step, init, xs)
    if reverse:
        ys = ys[::-1]
    return ys, h_f, c_f


def encoder_reference(tokens, params):
    x = jnp.take(params["embed"], tokens, axis=0)
    hs, cs = [], []
    for layer in params["lstm"]:
        outs = []
        for d in range(2):
            b = layer["b_ih"][d] + layer["b_hh"][d]
            ys, h_f, c_f = _lstm_ref_dir(x, layer["w_ih"][d], layer["w_hh"][d],
                                         b, reverse=(d == 1))
            outs.append(ys)
            hs.append(h_f)
            cs.append(c_f)
        x = jnp.concatenate(outs, axis=-1)
    return x, (jnp.stack(hs, axis=0), jnp.stack(cs, axis=0))


if __name__ == "__main__":
    # Small shapes: vocab=16, n_embed=32, n_hidden=32, n_layers=2, seq=8, batch=8
    VOCAB, N_EMBED, N_HIDDEN, N_LAYERS = 16, 32, 32, 2
    T, B = 8, 8
    PAD = 0

    key = jax.random.PRNGKey(0)
    k_tok, k_par = jax.random.split(key)
    params = make_params(k_par, VOCAB, N_EMBED, N_HIDDEN, N_LAYERS, PAD)
    kparams = prepare_params(params)                # one-time kernel layout prep
    tokens = jax.random.randint(k_tok, (T, B), 0, VOCAB, dtype=jnp.int32)

    enc = jax.jit(functools.partial(encoder_forward, pad_idx=PAD))
    output, (h_n, c_n) = enc(tokens, kparams)
    jax.block_until_ready((output, h_n, c_n))

    assert output.shape == (T, B, 2 * N_HIDDEN)
    assert h_n.shape == (N_LAYERS * 2, B, N_HIDDEN)
    assert c_n.shape == (N_LAYERS * 2, B, N_HIDDEN)

    # Cross-check against a pure-JAX reference LSTM (PyTorch gate order).
    ref_out, (ref_h, ref_c) = encoder_reference(tokens, params)
    for got, ref in ((output, ref_out), (h_n, ref_h), (c_n, ref_c)):
        err = float(jnp.max(jnp.abs(got - ref)))
        assert err < 2e-4, f"mismatch vs reference: {err}"

    print("KERNEL_OK")
</pallas_src>

<mosaic_0001>
module attributes {stable_mosaic.version = 11 : i64} {
  func.func @_bilstm_layer_kernel(%arg0: i32, %arg1: i32, %arg2: memref<1x8x8x128xf32, #tpu.memory_space<vmem>>, %arg3: memref<1x32x128xf32, #tpu.memory_space<vmem>>, %arg4: memref<1x8x8x32xf32, #tpu.memory_space<vmem>>, %arg5: memref<1x8x32xf32, #tpu.memory_space<vmem>>, %arg6: memref<1x8x32xf32, #tpu.memory_space<vmem>>, %arg7: memref<8x32xf32, #tpu.memory_space<vmem>>, %arg8: memref<8x32xf32, #tpu.memory_space<vmem>>) attributes {dimension_semantics = [#tpu.dimension_semantics<parallel>, #tpu.dimension_semantics<arbitrary>], iteration_bounds = array<i64: 2, 1>, scalar_prefetch = 0 : i64, scratch_operands = 2 : i64, tpu.core_type = #tpu.core_type<tc>, window_params = [{transform_indices = @transform_0, window_bounds = array<i64: 1, 8, 8, 128>}, {transform_indices = @transform_1, window_bounds = array<i64: 1, 32, 128>}, {transform_indices = @transform_2, window_bounds = array<i64: 1, 8, 8, 32>}, {transform_indices = @transform_3, window_bounds = array<i64: 1, 8, 32>}, {transform_indices = @transform_4, window_bounds = array<i64: 1, 8, 32>}]} {
    %c0_i32 = arith.constant 0 : i32
    %0 = arith.cmpi eq, %arg1, %c0_i32 : i32
    %1 = arith.extui %0 : i1 to i32
    %c0_i32_0 = arith.constant 0 : i32
    %2 = arith.cmpi ne, %1, %c0_i32_0 : i32
    scf.if %2 {
      %cst_93 = arith.constant 0.000000e+00 : f32
      %244 = vector.broadcast %cst_93 : f32 to vector<8x32xf32>
      %c0_94 = arith.constant 0 : index
      %c0_95 = arith.constant 0 : index
      %245 = vector.load %arg7[%c0_94, %c0_95] : memref<8x32xf32, #tpu.memory_space<vmem>>, vector<8x32xf32>
      tpu.vector_store %arg7[%c0_94, %c0_95], %244 {strides = array<i32>} : memref<8x32xf32, #tpu.memory_space<vmem>>, vector<8x32xf32>,
      %cst_96 = arith.constant 0.000000e+00 : f32
      %246 = vector.broadcast %cst_96 : f32 to vector<8x32xf32>
      %c0_97 = arith.constant 0 : index
      %c0_98 = arith.constant 0 : index
      %247 = vector.load %arg8[%c0_97, %c0_98] : memref<8x32xf32, #tpu.memory_space<vmem>>, vector<8x32xf32>
      tpu.vector_store %arg8[%c0_97, %c0_98], %246 {strides = array<i32>} : memref<8x32xf32, #tpu.memory_space<vmem>>, vector<8x32xf32>,
    } else {
    }
    %c0 = arith.constant 0 : index
    %c0_1 = arith.constant 0 : index
    %c0_2 = arith.constant 0 : index
    %3 = vector.load %arg3[%c0, %c0_1, %c0_2] : memref<1x32x128xf32, #tpu.memory_space<vmem>>, vector<1x32x128xf32>
    %4 = vector.shape_cast %3 : vector<1x32x128xf32> to vector<32x128xf32>
    %c0_3 = arith.constant 0 : index
    %c0_4 = arith.constant 0 : index
    %5 = vector.load %arg7[%c0_3, %c0_4] : memref<8x32xf32, #tpu.memory_space<vmem>>, vector<8x32xf32>
    %c0_5 = arith.constant 0 : index
    %c0_6 = arith.constant 0 : index
    %6 = vector.load %arg8[%c0_5, %c0_6] : memref<8x32xf32, #tpu.memory_space<vmem>>, vector<8x32xf32>
    %c0_i32_7 = arith.constant 0 : i32
    %c2_i32 = arith.constant 2 : i32
    %7 = arith.muli %c2_i32, %c0_i32_7 : i32
    %c7_i32 = arith.constant 7 : i32
    %8 = arith.subi %c7_i32, %7 : i32
    %9 = arith.muli %arg0, %8 : i32
    %10 = arith.addi %c0_i32_7, %9 : i32
    %c0_8 = arith.constant 0 : index
    %11 = arith.index_cast %10 : i32 to index
    %c0_9 = arith.constant 0 : index
    %c0_10 = arith.constant 0 : index
    %12 = vector.load %arg2[%c0_8, %11, %c0_9, %c0_10] : memref<1x8x8x128xf32, #tpu.memory_space<vmem>>, vector<1x1x8x128xf32>
    %13 = vector.shape_cast %12 : vector<1x1x8x128xf32> to vector<8x128xf32>
    %cst = arith.constant dense<0.000000e+00> : vector<8x128xf32>
    %14 = tpu.matmul %5, %4, %cst {dimension_numbers = #tpu.dot_dimension_numbers<[1], [0], [0], [1], [0, 0, 1, 1], [], []>} : vector<8x32xf32>, vector<32x128xf32>, vector<8x128xf32> -> vector<8x128xf32>
    %15 = arith.addf %13, %14 : vector<8x128xf32>
    %16 = vector.extract_strided_slice %15 {offsets = [0, 0], sizes = [8, 96], strides = [1, 1]} : vector<8x128xf32> to vector<8x96xf32>
    %17 = arith.negf %16 : vector<8x96xf32>
    %18 = math.exp %17 : vector<8x96xf32>
    %cst_11 = arith.constant 1.000000e+00 : f32
    %19 = vector.broadcast %cst_11 : f32 to vector<8x96xf32>
    %20 = arith.addf %19, %18 : vector<8x96xf32>
    %21 = arith.divf %19, %20 : vector<8x96xf32>
    %22 = vector.extract_strided_slice %15 {offsets = [0, 96], sizes = [8, 32], strides = [1, 1]} : vector<8x128xf32> to vector<8x32xf32>
    %23 = math.tanh %22 : vector<8x32xf32>
    %24 = vector.extract_strided_slice %21 {offsets = [0, 0], sizes = [8, 32], strides = [1, 1]} : vector<8x96xf32> to vector<8x32xf32>
    %25 = vector.extract_strided_slice %21 {offsets = [0, 32], sizes = [8, 32], strides = [1, 1]} : vector<8x96xf32> to vector<8x32xf32>
    %26 = vector.extract_strided_slice %21 {offsets = [0, 64], sizes = [8, 32], strides = [1, 1]} : vector<8x96xf32> to vector<8x32xf32>
    %27 = arith.mulf %25, %6 : vector<8x32xf32>
    %28 = arith.mulf %24, %23 : vector<8x32xf32>
    %29 = arith.addf %27, %28 : vector<8x32xf32>
    %30 = math.tanh %29 : vector<8x32xf32>
    %31 = arith.mulf %26, %30 : vector<8x32xf32>
    %c0_12 = arith.constant 0 : index
    %32 = arith.index_cast %10 : i32 to index
    %c0_13 = arith.constant 0 : index
    %c0_14 = arith.constant 0 : index
    %33 = vector.load %arg4[%c0_12, %32, %c0_13, %c0_14] : memref<1x8x8x32xf32, #tpu.memory_space<vmem>>, vector<1x1x8x32xf32>
    %34 = vector.shape_cast %33 : vector<1x1x8x32xf32> to vector<8x32xf32>
    %35 = vector.shape_cast %31 : vector<8x32xf32> to vector<1x1x8x32xf32>
    tpu.vector_store %arg4[%c0_12, %32, %c0_13, %c0_14], %35 {strides = array<i32>} : memref<1x8x8x32xf32, #tpu.memory_space<vmem>>, vector<1x1x8x32xf32>,
    %c1_i32 = arith.constant 1 : i32
    %c2_i32_15 = arith.constant 2 : i32
    %36 = arith.muli %c2_i32_15, %c1_i32 : i32
    %c7_i32_16 = arith.constant 7 : i32
    %37 = arith.subi %c7_i32_16, %36 : i32
    %38 = arith.muli %arg0, %37 : i32
    %39 = arith.addi %c1_i32, %38 : i32
    %c0_17 = arith.constant 0 : index
    %40 = arith.index_cast %39 : i32 to index
    %c0_18 = arith.constant 0 : index
    %c0_19 = arith.constant 0 : index
    %41 = vector.load %arg2[%c0_17, %40, %c0_18, %c0_19] : memref<1x8x8x128xf32, #tpu.memory_space<vmem>>, vector<1x1x8x128xf32>
    %42 = vector.shape_cast %41 : vector<1x1x8x128xf32> to vector<8x128xf32>
    %cst_20 = arith.constant dense<0.000000e+00> : vector<8x128xf32>
    %43 = tpu.matmul %31, %4, %cst_20 {dimension_numbers = #tpu.dot_dimension_numbers<[1], [0], [0], [1], [0, 0, 1, 1], [], []>} : vector<8x32xf32>, vector<32x128xf32>, vector<8x128xf32> -> vector<8x128xf32>
    %44 = arith.addf %42, %43 : vector<8x128xf32>
    %45 = vector.extract_strided_slice %44 {offsets = [0, 0], sizes = [8, 96], strides = [1, 1]} : vector<8x128xf32> to vector<8x96xf32>
    %46 = arith.negf %45 : vector<8x96xf32>
    %47 = math.exp %46 : vector<8x96xf32>
    %cst_21 = arith.constant 1.000000e+00 : f32
    %48 = vector.broadcast %cst_21 : f32 to vector<8x96xf32>
    %49 = arith.addf %48, %47 : vector<8x96xf32>
    %50 = arith.divf %48, %49 : vector<8x96xf32>
    %51 = vector.extract_strided_slice %44 {offsets = [0, 96], sizes = [8, 32], strides = [1, 1]} : vector<8x128xf32> to vector<8x32xf32>
    %52 = math.tanh %51 : vector<8x32xf32>
    %53 = vector.extract_strided_slice %50 {offsets = [0, 0], sizes = [8, 32], strides = [1, 1]} : vector<8x96xf32> to vector<8x32xf32>
    %54 = vector.extract_strided_slice %50 {offsets = [0, 32], sizes = [8, 32], strides = [1, 1]} : vector<8x96xf32> to vector<8x32xf32>
    %55 = vector.extract_strided_slice %50 {offsets = [0, 64], sizes = [8, 32], strides = [1, 1]} : vector<8x96xf32> to vector<8x32xf32>
    %56 = arith.mulf %54, %29 : vector<8x32xf32>
    %57 = arith.mulf %53, %52 : vector<8x32xf32>
    %58 = arith.addf %56, %57 : vector<8x32xf32>
    %59 = math.tanh %58 : vector<8x32xf32>
    %60 = arith.mulf %55, %59 : vector<8x32xf32>
    %c0_22 = arith.constant 0 : index
    %61 = arith.index_cast %39 : i32 to index
    %c0_23 = arith.constant 0 : index
    %c0_24 = arith.constant 0 : index
    %62 = vector.load %arg4[%c0_22, %61, %c0_23, %c0_24] : memref<1x8x8x32xf32, #tpu.memory_space<vmem>>, vector<1x1x8x32xf32>
    %63 = vector.shape_cast %62 : vector<1x1x8x32xf32> to vector<8x32xf32>
    %64 = vector.shape_cast %60 : vector<8x32xf32> to vector<1x1x8x32xf32>
    tpu.vector_store %arg4[%c0_22, %61, %c0_23, %c0_24], %64 {strides = array<i32>} : memref<1x8x8x32xf32, #tpu.memory_space<vmem>>, vector<1x1x8x32xf32>,
    %c2_i32_25 = arith.constant 2 : i32
    %c2_i32_26 = arith.constant 2 : i32
    %65 = arith.muli %c2_i32_26, %c2_i32_25 : i32
    %c7_i32_27 = arith.constant 7 : i32
    %66 = arith.subi %c7_i32_27, %65 : i32
    %67 = arith.muli %arg0, %66 : i32
    %68 = arith.addi %c2_i32_25, %67 : i32
    %c0_28 = arith.constant 0 : index
    %69 = arith.index_cast %68 : i32 to index
    %c0_29 = arith.constant 0 : index
    %c0_30 = arith.constant 0 : index
    %70 = vector.load %arg2[%c0_28, %69, %c0_29, %c0_30] : memref<1x8x8x128xf32, #tpu.memory_space<vmem>>, vector<1x1x8x128xf32>
    %71 = vector.shape_cast %70 : vector<1x1x8x128xf32> to vector<8x128xf32>
    %cst_31 = arith.constant dense<0.000000e+00> : vector<8x128xf32>
    %72 = tpu.matmul %60, %4, %cst_31 {dimension_numbers = #tpu.dot_dimension_numbers<[1], [0], [0], [1], [0, 0, 1, 1], [], []>} : vector<8x32xf32>, vector<32x128xf32>, vector<8x128xf32> -> vector<8x128xf32>
    %73 = arith.addf %71, %72 : vector<8x128xf32>
    %74 = vector.extract_strided_slice %73 {offsets = [0, 0], sizes = [8, 96], strides = [1, 1]} : vector<8x128xf32> to vector<8x96xf32>
    %75 = arith.negf %74 : vector<8x96xf32>
    %76 = math.exp %75 : vector<8x96xf32>
    %cst_32 = arith.constant 1.000000e+00 : f32
    %77 = vector.broadcast %cst_32 : f32 to vector<8x96xf32>
    %78 = arith.addf %77, %76 : vector<8x96xf32>
    %79 = arith.divf %77, %78 : vector<8x96xf32>
    %80 = vector.extract_strided_slice %73 {offsets = [0, 96], sizes = [8, 32], strides = [1, 1]} : vector<8x128xf32> to vector<8x32xf32>
    %81 = math.tanh %80 : vector<8x32xf32>
    %82 = vector.extract_strided_slice %79 {offsets = [0, 0], sizes = [8, 32], strides = [1, 1]} : vector<8x96xf32> to vector<8x32xf32>
    %83 = vector.extract_strided_slice %79 {offsets = [0, 32], sizes = [8, 32], strides = [1, 1]} : vector<8x96xf32> to vector<8x32xf32>
    %84 = vector.extract_strided_slice %79 {offsets = [0, 64], sizes = [8, 32], strides = [1, 1]} : vector<8x96xf32> to vector<8x32xf32>
    %85 = arith.mulf %83, %58 : vector<8x32xf32>
    %86 = arith.mulf %82, %81 : vector<8x32xf32>
    %87 = arith.addf %85, %86 : vector<8x32xf32>
    %88 = math.tanh %87 : vector<8x32xf32>
    %89 = arith.mulf %84, %88 : vector<8x32xf32>
    %c0_33 = arith.constant 0 : index
    %90 = arith.index_cast %68 : i32 to index
    %c0_34 = arith.constant 0 : index
    %c0_35 = arith.constant 0 : index
    %91 = vector.load %arg4[%c0_33, %90, %c0_34, %c0_35] : memref<1x8x8x32xf32, #tpu.memory_space<vmem>>, vector<1x1x8x32xf32>
    %92 = vector.shape_cast %91 : vector<1x1x8x32xf32> to vector<8x32xf32>
    %93 = vector.shape_cast %89 : vector<8x32xf32> to vector<1x1x8x32xf32>
    tpu.vector_store %arg4[%c0_33, %90, %c0_34, %c0_35], %93 {strides = array<i32>} : memref<1x8x8x32xf32, #tpu.memory_space<vmem>>, vector<1x1x8x32xf32>,
    %c3_i32 = arith.constant 3 : i32
    %c2_i32_36 = arith.constant 2 : i32
    %94 = arith.muli %c2_i32_36, %c3_i32 : i32
    %c7_i32_37 = arith.constant 7 : i32
    %95 = arith.subi %c7_i32_37, %94 : i32
    %96 = arith.muli %arg0, %95 : i32
    %97 = arith.addi %c3_i32, %96 : i32
    %c0_38 = arith.constant 0 : index
    %98 = arith.index_cast %97 : i32 to index
    %c0_39 = arith.constant 0 : index
    %c0_40 = arith.constant 0 : index
    %99 = vector.load %arg2[%c0_38, %98, %c0_39, %c0_40] : memref<1x8x8x128xf32, #tpu.memory_space<vmem>>, vector<1x1x8x128xf32>
    %100 = vector.shape_cast %99 : vector<1x1x8x128xf32> to vector<8x128xf32>
    %cst_41 = arith.constant dense<0.000000e+00> : vector<8x128xf32>
    %101 = tpu.matmul %89, %4, %cst_41 {dimension_numbers = #tpu.dot_dimension_numbers<[1], [0], [0], [1], [0, 0, 1, 1], [], []>} : vector<8x32xf32>, vector<32x128xf32>, vector<8x128xf32> -> vector<8x128xf32>
    %102 = arith.addf %100, %101 : vector<8x128xf32>
    %103 = vector.extract_strided_slice %102 {offsets = [0, 0], sizes = [8, 96], strides = [1, 1]} : vector<8x128xf32> to vector<8x96xf32>
    %104 = arith.negf %103 : vector<8x96xf32>
    %105 = math.exp %104 : vector<8x96xf32>
    %cst_42 = arith.constant 1.000000e+00 : f32
    %106 = vector.broadcast %cst_42 : f32 to vector<8x96xf32>
    %107 = arith.addf %106, %105 : vector<8x96xf32>
    %108 = arith.divf %106, %107 : vector<8x96xf32>
    %109 = vector.extract_strided_slice %102 {offsets = [0, 96], sizes = [8, 32], strides = [1, 1]} : vector<8x128xf32> to vector<8x32xf32>
    %110 = math.tanh %109 : vector<8x32xf32>
    %111 = vector.extract_strided_slice %108 {offsets = [0, 0], sizes = [8, 32], strides = [1, 1]} : vector<8x96xf32> to vector<8x32xf32>
    %112 = vector.extract_strided_slice %108 {offsets = [0, 32], sizes = [8, 32], strides = [1, 1]} : vector<8x96xf32> to vector<8x32xf32>
    %113 = vector.extract_strided_slice %108 {offsets = [0, 64], sizes = [8, 32], strides = [1, 1]} : vector<8x96xf32> to vector<8x32xf32>
    %114 = arith.mulf %112, %87 : vector<8x32xf32>
    %115 = arith.mulf %111, %110 : vector<8x32xf32>
    %116 = arith.addf %114, %115 : vector<8x32xf32>
    %117 = math.tanh %116 : vector<8x32xf32>
    %118 = arith.mulf %113, %117 : vector<8x32xf32>
    %c0_43 = arith.constant 0 : index
    %119 = arith.index_cast %97 : i32 to index
    %c0_44 = arith.constant 0 : index
    %c0_45 = arith.constant 0 : index
    %120 = vector.load %arg4[%c0_43, %119, %c0_44, %c0_45] : memref<1x8x8x32xf32, #tpu.memory_space<vmem>>, vector<1x1x8x32xf32>
    %121 = vector.shape_cast %120 : vector<1x1x8x32xf32> to vector<8x32xf32>
    %122 = vector.shape_cast %118 : vector<8x32xf32> to vector<1x1x8x32xf32>
    tpu.vector_store %arg4[%c0_43, %119, %c0_44, %c0_45], %122 {strides = array<i32>} : memref<1x8x8x32xf32, #tpu.memory_space<vmem>>, vector<1x1x8x32xf32>,
    %c4_i32 = arith.constant 4 : i32
    %c2_i32_46 = arith.constant 2 : i32
    %123 = arith.muli %c2_i32_46, %c4_i32 : i32
    %c7_i32_47 = arith.constant 7 : i32
    %124 = arith.subi %c7_i32_47, %123 : i32
    %125 = arith.muli %arg0, %124 : i32
    %126 = arith.addi %c4_i32, %125 : i32
    %c0_48 = arith.constant 0 : index
    %127 = arith.index_cast %126 : i32 to index
    %c0_49 = arith.constant 0 : index
    %c0_50 = arith.constant 0 : index
    %128 = vector.load %arg2[%c0_48, %127, %c0_49, %c0_50] : memref<1x8x8x128xf32, #tpu.memory_space<vmem>>, vector<1x1x8x128xf32>
    %129 = vector.shape_cast %128 : vector<1x1x8x128xf32> to vector<8x128xf32>
    %cst_51 = arith.constant dense<0.000000e+00> : vector<8x128xf32>
    %130 = tpu.matmul %118, %4, %cst_51 {dimension_numbers = #tpu.dot_dimension_numbers<[1], [0], [0], [1], [0, 0, 1, 1], [], []>} : vector<8x32xf32>, vector<32x128xf32>, vector<8x128xf32> -> vector<8x128xf32>
    %131 = arith.addf %129, %130 : vector<8x128xf32>
    %132 = vector.extract_strided_slice %131 {offsets = [0, 0], sizes = [8, 96], strides = [1, 1]} : vector<8x128xf32> to vector<8x96xf32>
    %133 = arith.negf %132 : vector<8x96xf32>
    %134 = math.exp %133 : vector<8x96xf32>
    %cst_52 = arith.constant 1.000000e+00 : f32
    %135 = vector.broadcast %cst_52 : f32 to vector<8x96xf32>
    %136 = arith.addf %135, %134 : vector<8x96xf32>
    %137 = arith.divf %135, %136 : vector<8x96xf32>
    %138 = vector.extract_strided_slice %131 {offsets = [0, 96], sizes = [8, 32], strides = [1, 1]} : vector<8x128xf32> to vector<8x32xf32>
    %139 = math.tanh %138 : vector<8x32xf32>
    %140 = vector.extract_strided_slice %137 {offsets = [0, 0], sizes = [8, 32], strides = [1, 1]} : vector<8x96xf32> to vector<8x32xf32>
    %141 = vector.extract_strided_slice %137 {offsets = [0, 32], sizes = [8, 32], strides = [1, 1]} : vector<8x96xf32> to vector<8x32xf32>
    %142 = vector.extract_strided_slice %137 {offsets = [0, 64], sizes = [8, 32], strides = [1, 1]} : vector<8x96xf32> to vector<8x32xf32>
    %143 = arith.mulf %141, %116 : vector<8x32xf32>
    %144 = arith.mulf %140, %139 : vector<8x32xf32>
    %145 = arith.addf %143, %144 : vector<8x32xf32>
    %146 = math.tanh %145 : vector<8x32xf32>
    %147 = arith.mulf %142, %146 : vector<8x32xf32>
    %c0_53 = arith.constant 0 : index
    %148 = arith.index_cast %126 : i32 to index
    %c0_54 = arith.constant 0 : index
    %c0_55 = arith.constant 0 : index
    %149 = vector.load %arg4[%c0_53, %148, %c0_54, %c0_55] : memref<1x8x8x32xf32, #tpu.memory_space<vmem>>, vector<1x1x8x32xf32>
    %150 = vector.shape_cast %149 : vector<1x1x8x32xf32> to vector<8x32xf32>
    %151 = vector.shape_cast %147 : vector<8x32xf32> to vector<1x1x8x32xf32>
    tpu.vector_store %arg4[%c0_53, %148, %c0_54, %c0_55], %151 {strides = array<i32>} : memref<1x8x8x32xf32, #tpu.memory_space<vmem>>, vector<1x1x8x32xf32>,
    %c5_i32 = arith.constant 5 : i32
    %c2_i32_56 = arith.constant 2 : i32
    %152 = arith.muli %c2_i32_56, %c5_i32 : i32
    %c7_i32_57 = arith.constant 7 : i32
    %153 = arith.subi %c7_i32_57, %152 : i32
    %154 = arith.muli %arg0, %153 : i32
    %155 = arith.addi %c5_i32, %154 : i32
    %c0_58 = arith.constant 0 : index
    %156 = arith.index_cast %155 : i32 to index
    %c0_59 = arith.constant 0 : index
    %c0_60 = arith.constant 0 : index
    %157 = vector.load %arg2[%c0_58, %156, %c0_59, %c0_60] : memref<1x8x8x128xf32, #tpu.memory_space<vmem>>, vector<1x1x8x128xf32>
    %158 = vector.shape_cast %157 : vector<1x1x8x128xf32> to vector<8x128xf32>
    %cst_61 = arith.constant dense<0.000000e+00> : vector<8x128xf32>
    %159 = tpu.matmul %147, %4, %cst_61 {dimension_numbers = #tpu.dot_dimension_numbers<[1], [0], [0], [1], [0, 0, 1, 1], [], []>} : vector<8x32xf32>, vector<32x128xf32>, vector<8x128xf32> -> vector<8x128xf32>
    %160 = arith.addf %158, %159 : vector<8x128xf32>
    %161 = vector.extract_strided_slice %160 {offsets = [0, 0], sizes = [8, 96], strides = [1, 1]} : vector<8x128xf32> to vector<8x96xf32>
    %162 = arith.negf %161 : vector<8x96xf32>
    %163 = math.exp %162 : vector<8x96xf32>
    %cst_62 = arith.constant 1.000000e+00 : f32
    %164 = vector.broadcast %cst_62 : f32 to vector<8x96xf32>
    %165 = arith.addf %164, %163 : vector<8x96xf32>
    %166 = arith.divf %164, %165 : vector<8x96xf32>
    %167 = vector.extract_strided_slice %160 {offsets = [0, 96], sizes = [8, 32], strides = [1, 1]} : vector<8x128xf32> to vector<8x32xf32>
    %168 = math.tanh %167 : vector<8x32xf32>
    %169 = vector.extract_strided_slice %166 {offsets = [0, 0], sizes = [8, 32], strides = [1, 1]} : vector<8x96xf32> to vector<8x32xf32>
    %170 = vector.extract_strided_slice %166 {offsets = [0, 32], sizes = [8, 32], strides = [1, 1]} : vector<8x96xf32> to vector<8x32xf32>
    %171 = vector.extract_strided_slice %166 {offsets = [0, 64], sizes = [8, 32], strides = [1, 1]} : vector<8x96xf32> to vector<8x32xf32>
    %172 = arith.mulf %170, %145 : vector<8x32xf32>
    %173 = arith.mulf %169, %168 : vector<8x32xf32>
    %174 = arith.addf %172, %173 : vector<8x32xf32>
    %175 = math.tanh %174 : vector<8x32xf32>
    %176 = arith.mulf %171, %175 : vector<8x32xf32>
    %c0_63 = arith.constant 0 : index
    %177 = arith.index_cast %155 : i32 to index
    %c0_64 = arith.constant 0 : index
    %c0_65 = arith.constant 0 : index
    %178 = vector.load %arg4[%c0_63, %177, %c0_64, %c0_65] : memref<1x8x8x32xf32, #tpu.memory_space<vmem>>, vector<1x1x8x32xf32>
    %179 = vector.shape_cast %178 : vector<1x1x8x32xf32> to vector<8x32xf32>
    %180 = vector.shape_cast %176 : vector<8x32xf32> to vector<1x1x8x32xf32>
    tpu.vector_store %arg4[%c0_63, %177, %c0_64, %c0_65], %180 {strides = array<i32>} : memref<1x8x8x32xf32, #tpu.memory_space<vmem>>, vector<1x1x8x32xf32>,
    %c6_i32 = arith.constant 6 : i32
    %c2_i32_66 = arith.constant 2 : i32
    %181 = arith.muli %c2_i32_66, %c6_i32 : i32
    %c7_i32_67 = arith.constant 7 : i32
    %182 = arith.subi %c7_i32_67, %181 : i32
    %183 = arith.muli %arg0, %182 : i32
    %184 = arith.addi %c6_i32, %183 : i32
    %c0_68 = arith.constant 0 : index
    %185 = arith.index_cast %184 : i32 to index
    %c0_69 = arith.constant 0 : index
    %c0_70 = arith.constant 0 : index
    %186 = vector.load %arg2[%c0_68, %185, %c0_69, %c0_70] : memref<1x8x8x128xf32, #tpu.memory_space<vmem>>, vector<1x1x8x128xf32>
    %187 = vector.shape_cast %186 : vector<1x1x8x128xf32> to vector<8x128xf32>
    %cst_71 = arith.constant dense<0.000000e+00> : vector<8x128xf32>
    %188 = tpu.matmul %176, %4, %cst_71 {dimension_numbers = #tpu.dot_dimension_numbers<[1], [0], [0], [1], [0, 0, 1, 1], [], []>} : vector<8x32xf32>, vector<32x128xf32>, vector<8x128xf32> -> vector<8x128xf32>
    %189 = arith.addf %187, %188 : vector<8x128xf32>
    %190 = vector.extract_strided_slice %189 {offsets = [0, 0], sizes = [8, 96], strides = [1, 1]} : vector<8x128xf32> to vector<8x96xf32>
    %191 = arith.negf %190 : vector<8x96xf32>
    %192 = math.exp %191 : vector<8x96xf32>
    %cst_72 = arith.constant 1.000000e+00 : f32
    %193 = vector.broadcast %cst_72 : f32 to vector<8x96xf32>
    %194 = arith.addf %193, %192 : vector<8x96xf32>
    %195 = arith.divf %193, %194 : vector<8x96xf32>
    %196 = vector.extract_strided_slice %189 {offsets = [0, 96], sizes = [8, 32], strides = [1, 1]} : vector<8x128xf32> to vector<8x32xf32>
    %197 = math.tanh %196 : vector<8x32xf32>
    %198 = vector.extract_strided_slice %195 {offsets = [0, 0], sizes = [8, 32], strides = [1, 1]} : vector<8x96xf32> to vector<8x32xf32>
    %199 = vector.extract_strided_slice %195 {offsets = [0, 32], sizes = [8, 32], strides = [1, 1]} : vector<8x96xf32> to vector<8x32xf32>
    %200 = vector.extract_strided_slice %195 {offsets = [0, 64], sizes = [8, 32], strides = [1, 1]} : vector<8x96xf32> to vector<8x32xf32>
    %201 = arith.mulf %199, %174 : vector<8x32xf32>
    %202 = arith.mulf %198, %197 : vector<8x32xf32>
    %203 = arith.addf %201, %202 : vector<8x32xf32>
    %204 = math.tanh %203 : vector<8x32xf32>
    %205 = arith.mulf %200, %204 : vector<8x32xf32>
    %c0_73 = arith.constant 0 : index
    %206 = arith.index_cast %184 : i32 to index
    %c0_74 = arith.constant 0 : index
    %c0_75 = arith.constant 0 : index
    %207 = vector.load %arg4[%c0_73, %206, %c0_74, %c0_75] : memref<1x8x8x32xf32, #tpu.memory_space<vmem>>, vector<1x1x8x32xf32>
    %208 = vector.shape_cast %207 : vector<1x1x8x32xf32> to vector<8x32xf32>
    %209 = vector.shape_cast %205 : vector<8x32xf32> to vector<1x1x8x32xf32>
    tpu.vector_store %arg4[%c0_73, %206, %c0_74, %c0_75], %209 {strides = array<i32>} : memref<1x8x8x32xf32, #tpu.memory_space<vmem>>, vector<1x1x8x32xf32>,
    %c7_i32_76 = arith.constant 7 : i32
    %c2_i32_77 = arith.constant 2 : i32
    %210 = arith.muli %c2_i32_77, %c7_i32_76 : i32
    %c7_i32_78 = arith.constant 7 : i32
    %211 = arith.subi %c7_i32_78, %210 : i32
    %212 = arith.muli %arg0, %211 : i32
    %213 = arith.addi %c7_i32_76, %212 : i32
    %c0_79 = arith.constant 0 : index
    %214 = arith.index_cast %213 : i32 to index
    %c0_80 = arith.constant 0 : index
    %c0_81 = arith.constant 0 : index
    %215 = vector.load %arg2[%c0_79, %214, %c0_80, %c0_81] : memref<1x8x8x128xf32, #tpu.memory_space<vmem>>, vector<1x1x8x128xf32>
    %216 = vector.shape_cast %215 : vector<1x1x8x128xf32> to vector<8x128xf32>
    %cst_82 = arith.constant dense<0.000000e+00> : vector<8x128xf32>
    %217 = tpu.matmul %205, %4, %cst_82 {dimension_numbers = #tpu.dot_dimension_numbers<[1], [0], [0], [1], [0, 0, 1, 1], [], []>} : vector<8x32xf32>, vector<32x128xf32>, vector<8x128xf32> -> vector<8x128xf32>
    %218 = arith.addf %216, %217 : vector<8x128xf32>
    %219 = vector.extract_strided_slice %218 {offsets = [0, 0], sizes = [8, 96], strides = [1, 1]} : vector<8x128xf32> to vector<8x96xf32>
    %220 = arith.negf %219 : vector<8x96xf32>
    %221 = math.exp %220 : vector<8x96xf32>
    %cst_83 = arith.constant 1.000000e+00 : f32
    %222 = vector.broadcast %cst_83 : f32 to vector<8x96xf32>
    %223 = arith.addf %222, %221 : vector<8x96xf32>
    %224 = arith.divf %222, %223 : vector<8x96xf32>
    %225 = vector.extract_strided_slice %218 {offsets = [0, 96], sizes = [8, 32], strides = [1, 1]} : vector<8x128xf32> to vector<8x32xf32>
    %226 = math.tanh %225 : vector<8x32xf32>
    %227 = vector.extract_strided_slice %224 {offsets = [0, 0], sizes = [8, 32], strides = [1, 1]} : vector<8x96xf32> to vector<8x32xf32>
    %228 = vector.extract_strided_slice %224 {offsets = [0, 32], sizes = [8, 32], strides = [1, 1]} : vector<8x96xf32> to vector<8x32xf32>
    %229 = vector.extract_strided_slice %224 {offsets = [0, 64], sizes = [8, 32], strides = [1, 1]} : vector<8x96xf32> to vector<8x32xf32>
    %230 = arith.mulf %228, %203 : vector<8x32xf32>
    %231 = arith.mulf %227, %226 : vector<8x32xf32>
    %232 = arith.addf %230, %231 : vector<8x32xf32>
    %233 = math.tanh %232 : vector<8x32xf32>
    %234 = arith.mulf %229, %233 : vector<8x32xf32>
    %c0_84 = arith.constant 0 : index
    %235 = arith.index_cast %213 : i32 to index
    %c0_85 = arith.constant 0 : index
    %c0_86 = arith.constant 0 : index
    %236 = vector.load %arg4[%c0_84, %235, %c0_85, %c0_86] : memref<1x8x8x32xf32, #tpu.memory_space<vmem>>, vector<1x1x8x32xf32>
    %237 = vector.shape_cast %236 : vector<1x1x8x32xf32> to vector<8x32xf32>
    %238 = vector.shape_cast %234 : vector<8x32xf32> to vector<1x1x8x32xf32>
    tpu.vector_store %arg4[%c0_84, %235, %c0_85, %c0_86], %238 {strides = array<i32>} : memref<1x8x8x32xf32, #tpu.memory_space<vmem>>, vector<1x1x8x32xf32>,
    %c8_i32 = arith.constant 8 : i32
    %c0_87 = arith.constant 0 : index
    %c0_88 = arith.constant 0 : index
    %239 = vector.load %arg7[%c0_87, %c0_88] : memref<8x32xf32, #tpu.memory_space<vmem>>, vector<8x32xf32>
    tpu.vector_store %arg7[%c0_87, %c0_88], %234 {strides = array<i32>} : memref<8x32xf32, #tpu.memory_space<vmem>>, vector<8x32xf32>,
    %c0_89 = arith.constant 0 : index
    %c0_90 = arith.constant 0 : index
    %240 = vector.load %arg8[%c0_89, %c0_90] : memref<8x32xf32, #tpu.memory_space<vmem>>, vector<8x32xf32>
    tpu.vector_store %arg8[%c0_89, %c0_90], %232 {strides = array<i32>} : memref<8x32xf32, #tpu.memory_space<vmem>>, vector<8x32xf32>,
    %c0_i32_91 = arith.constant 0 : i32
    %241 = arith.cmpi eq, %arg1, %c0_i32_91 : i32
    %242 = arith.extui %241 : i1 to i32
    %c0_i32_92 = arith.constant 0 : i32
    %243 = arith.cmpi ne, %242, %c0_i32_92 : i32
    scf.if %243 {
      %c0_93 = arith.constant 0 : index
      %c0_94 = arith.constant 0 : index
      %c0_95 = arith.constant 0 : index
      %244 = vector.load %arg5[%c0_93, %c0_94, %c0_95] : memref<1x8x32xf32, #tpu.memory_space<vmem>>, vector<1x8x32xf32>
      %245 = vector.shape_cast %244 : vector<1x8x32xf32> to vector<8x32xf32>
      %246 = vector.shape_cast %234 : vector<8x32xf32> to vector<1x8x32xf32>
      tpu.vector_store %arg5[%c0_93, %c0_94, %c0_95], %246 {strides = array<i32>} : memref<1x8x32xf32, #tpu.memory_space<vmem>>, vector<1x8x32xf32>,
      %c0_96 = arith.constant 0 : index
      %c0_97 = arith.constant 0 : index
      %c0_98 = arith.constant 0 : index
      %247 = vector.load %arg6[%c0_96, %c0_97, %c0_98] : memref<1x8x32xf32, #tpu.memory_space<vmem>>, vector<1x8x32xf32>
      %248 = vector.shape_cast %247 : vector<1x8x32xf32> to vector<8x32xf32>
      %249 = vector.shape_cast %232 : vector<8x32xf32> to vector<1x8x32xf32>
      tpu.vector_store %arg6[%c0_96, %c0_97, %c0_98], %249 {strides = array<i32>} : memref<1x8x32xf32, #tpu.memory_space<vmem>>, vector<1x8x32xf32>,
    } else {
    }
    return
  }
  func.func @transform_0(%arg0: i32, %arg1: i32) -> (i32, i32, i32, i32) {
    %c2_i32 = arith.constant 2 : i32
    %0 = arith.muli %c2_i32, %arg1 : i32
    %c0_i32 = arith.constant 0 : i32
    %1 = arith.subi %c0_i32, %0 : i32
    %2 = arith.muli %arg0, %1 : i32
    %3 = arith.addi %arg1, %2 : i32
    %c0_i32_0 = arith.constant 0 : i32
    %c0_i32_1 = arith.constant 0 : i32
    %c0_i32_2 = arith.constant 0 : i32
    return %arg0, %3, %c0_i32_0, %c0_i32_1 : i32, i32, i32, i32
  }
  func.func @transform_1(%arg0: i32, %arg1: i32) -> (i32, i32, i32) {
    %c0_i32 = arith.constant 0 : i32
    %c0_i32_0 = arith.constant 0 : i32
    %c0_i32_1 = arith.constant 0 : i32
    return %arg0, %c0_i32, %c0_i32_0 : i32, i32, i32
  }
  func.func @transform_2(%arg0: i32, %arg1: i32) -> (i32, i32, i32, i32) {
    %c2_i32 = arith.constant 2 : i32
    %0 = arith.muli %c2_i32, %arg1 : i32
    %c0_i32 = arith.constant 0 : i32
    %1 = arith.subi %c0_i32, %0 : i32
    %2 = arith.muli %arg0, %1 : i32
    %3 = arith.addi %arg1, %2 : i32
    %c0_i32_0 = arith.constant 0 : i32
    %c0_i32_1 = arith.constant 0 : i32
    %c0_i32_2 = arith.constant 0 : i32
    return %arg0, %3, %c0_i32_0, %c0_i32_1 : i32, i32, i32, i32
  }
  func.func @transform_3(%arg0: i32, %arg1: i32) -> (i32, i32, i32) {
    %c0_i32 = arith.constant 0 : i32
    %c0_i32_0 = arith.constant 0 : i32
    %c0_i32_1 = arith.constant 0 : i32
    return %arg0, %c0_i32, %c0_i32_0 : i32, i32, i32
  }
  func.func @transform_4(%arg0: i32, %arg1: i32) -> (i32, i32, i32) {
    %c0_i32 = arith.constant 0 : i32
    %c0_i32_0 = arith.constant 0 : i32
    %c0_i32_1 = arith.constant 0 : i32
    return %arg0, %c0_i32, %c0_i32_0 : i32, i32, i32
  }
}

</mosaic_0001>

<bundles_post_ra>
// kernel: encoder_forward.2
= control target key start
LH: loop header
LB: loop body
LE: loop exit
PB: predicated region body
PF: predicated region fallthrough
CT: control target
= control target key end

     0   :  { %s1353_s15 = smov 0   ;;  %s1355_s16 = smov 0   ;;  %s1523_s0 = inlined_call_operand.vmem [shape: f32[2,8,8,128], index: 0, kind: input, shape index: {}]   ;;  %s1524_s1 = inlined_call_operand.vmem [shape: f32[2,32,128], index: 1, kind: input, shape index: {}]   ;;  %s1525_s2 = inlined_call_operand.vmem [shape: f32[2,8,8,32], index: 2, kind: output, shape index: {0}]   ;;  %s1526_s3 = inlined_call_operand.vmem [shape: f32[2,8,32], index: 3, kind: output, shape index: {1}]   ;;  %s1527_s4 = inlined_call_operand.vmem [shape: f32[2,8,32], index: 4, kind: output, shape index: {2}]  }
   0x1   :  { %s1357_s17 = smov 0  }
   0x2 LB: > { %s27_s18 = sadd.s32 1, %s1318_s16  ;;  %p1152_p0 = scmp.ge.s32.totalorder %s1322_s17, 1  ;;  %s1322_s17 = sphi %s1357_s17, %s15_s17   ;;  %s1318_s16 = sphi %s1355_s16, %s1529_s16   ;;  %s1314_s15 = sphi %s1353_s15, %s1528_s15  }
   0x3   : > { %p29_p1 = scmp.ge.s32.totalorder %s27_s18, 2  ;;  %p222_p2 = scmp.lt.s32.totalorder %s1322_s17, 3 }
   0x5   : > { %s1531_s18 = smov (%p29_p1, %s27_s18), 0  ;;  %p223_p3 = pnand %p1152_p0, %p222_p2 }
   0x6   : > { %p282_p4 = scmp.lt.s32.totalorder (!%p223_p3), %s1314_s15, 1  ;;  %s1161_s25 = smul.u32 (!%p223_p3), 56, %s1314_s15 }
   0x7   : > { %226 = sbr.rel (%p223_p3) target bundleno = 4651 (0x122b), region = 28  ;;  %s1325_s30 = smov (!%p223_p3), 32  }
   0x8   : > { %s1326_s5 = smov (!%p223_p3), 64   ;;  %s1164_s10 = smul.u32 (!%p223_p3), 40, %s1314_s15 }
   0x9   : > { %s1170_s13 = smul.u32 (!%p223_p3), 24, %s1314_s15  ;;  %s1176_s21 = sshll.u32 (!%p223_p3), %s1314_s15, 3 }
   0xc   : > { %vm330_vm0 = vcmask 261120   ;;  %v1324_v0 = vmov 0.0   ;;  %s1376_s19 = scalar_select %p282_p4, %s1314_s15, 1 }
   0xd   : > { %331 = vst.msk [vmem:[#allocation2] sm:$0xff] %vm330_vm0, %v1324_v0 }
   0xe   : > { %332 = vst.msk [vmem:[#allocation3] sm:$0xff] %vm330_vm0, %v1324_v0  ;;  %s1206_s20 = sshll.u32 %s1376_s19, 5  ;;  %s1205_s24 = sshll.u32 %s1376_s19, 6 }
   0xf   : > { %s299_s23 = scalar_lea.vmem %s1524_s1, %s1206_s20  ;;  %s1391_s28 = scalar_lea.vmem %s1523_s0, %s1205_s24 }
  0x10   : > { %v336_v1 = vld [vmem:[%s299_s23 + $0x18] sm:$0xff]  ;;  %v335_v2 = vld [vmem:[%s299_s23 + $0x10] sm:$0xff]  ;;  %v334_v3 = vld [vmem:[%s299_s23 + $0x8] sm:$0xff]  ;;  %s341_s29 = scalar_lea.vmem %s1391_s28, %s1161_s25  ;;  %s1406_s8 = scalar_lea.vmem %s1525_s2, %s1205_s24 }
  0x11   : > { %359 = vmatpush.msra.mxu0 %v336_v1  ;;  %434 = vmatpush.msra.mxu1 %v336_v1  ;;  %v333_v4 = vld [vmem:[%s299_s23] sm:$0xff]  ;;  %s413_s9 = scalar_lea.vmem %s1406_s8, %s1161_s25  ;;  %s1031_s11 = scalar_lea.vmem %s1391_s28, %s1164_s10 }
  0x12   : > { %505 = vmatpush.msra.mxu2 %v336_v1  ;;  %575 = vmatpush.msra.mxu3 %v336_v1  ;;  %v342_v6 = vld [vmem:[%s341_s29] sm:$0xff]  ;;  %v1165_v34 = vld [vmem:[%s1031_s11 + $0x8] sm:$0xff]  ;;  %s1035_s12 = scalar_lea.vmem %s1406_s8, %s1164_s10  ;;  %s1039_s14 = scalar_lea.vmem %s1391_s28, %s1170_s13 }
  0x13   : > { %360 = vmatpush.msra.mxu0 %v335_v2  ;;  %435 = vmatpush.msra.mxu1 %v335_v2  ;;  %v1171_v60 = vld [vmem:[%s1039_s14 + $0x10] sm:$0xff]  ;;  %s1043_s20 = scalar_lea.vmem %s1406_s8, %s1170_s13  ;;  %s1046_s22 = scalar_lea.vmem %s1391_s28, %s1176_s21 }
  0x14   : > { %506 = vmatpush.msra.mxu2 %v335_v2  ;;  %576 = vmatpush.msra.mxu3 %v335_v2  ;;  %v337_v5 = vld [vmem:[#allocation2] sm:$0xff]  ;;  %s1049_s23 = scalar_lea.vmem %s1406_s8, %s1176_s21  ;;  %s627_s24 = ssub.s32 4, %s1314_s15 }
  0x15   : > { %361 = vmatpush.msra.mxu0 %v334_v3  ;;  %436 = vmatpush.msra.mxu1 %v334_v3  ;;  %v338_v10 = vld [vmem:[#allocation3] sm:$0xff]  ;;  %s1453_s25 = sshll.u32 %s627_s24, 3  ;;  %s1185_s29 = smul.u32 4294967272, %s1314_s15 }
  0x16   : > { %507 = vmatpush.msra.mxu2 %v334_v3  ;;  %577 = vmatpush.msra.mxu3 %v334_v3  ;;  %s629_s26 = scalar_lea.vmem %s1391_s28, %s1453_s25  ;;  %s695_s27 = scalar_lea.vmem %s1406_s8, %s1453_s25 }
  0x17   : > { %362 = vmatpush.msra.mxu0 %v333_v4  ;;  %437 = vmatpush.msra.mxu1 %v333_v4  ;;  %s1057_s6 = scalar_lea.vmem %s1391_s28, %s1185_s29  ;;  %s1061_s7 = scalar_lea.vmem %s1406_s8, %s1185_s29 }
  0x18   : > { %1162 = vmatmul.msk.f32.vlgmr.msra.gmra.mxu0 %vm330_vm0, %v337_v5  ;;  %508 = vmatpush.msra.mxu2 %v333_v4  ;;  %s1159_s14 = sshll.u32 %s1376_s19, 3 }
  0x19   : > { %578 = vmatpush.msra.mxu3 %v333_v4  ;;  %645 = vmatpush.msrb.mxu0 %v336_v1 }
  0x1a   : > { %716 = vmatpush.msrb.mxu1 %v336_v1  ;;  %787 = vmatpush.msrb.mxu2 %v336_v1 }
  0x1b   : > { %646 = vmatpush.msrb.mxu0 %v335_v2  ;;  %858 = vmatpush.msrb.mxu3 %v336_v1 }
  0x1c   : > { %717 = vmatpush.msrb.mxu1 %v335_v2  ;;  %788 = vmatpush.msrb.mxu2 %v335_v2 }
  0x1d   : > { %647 = vmatpush.msrb.mxu0 %v334_v3  ;;  %859 = vmatpush.msrb.mxu3 %v335_v2 }
  0x1e   : > { %718 = vmatpush.msrb.mxu1 %v334_v3  ;;  %789 = vmatpush.msrb.mxu2 %v334_v3 }
  0x1f   : > { %648 = vmatpush.msrb.mxu0 %v333_v4  ;;  %860 = vmatpush.msrb.mxu3 %v334_v3 }
  0x20   : > { %719 = vmatpush.msrb.mxu1 %v333_v4  ;;  %790 = vmatpush.msrb.mxu2 %v333_v4 }
  0x21   : > { %861 = vmatpush.msrb.mxu3 %v333_v4 }
  0x95   : > { %v364_v7 = vpop.f32.mrf.mxu0 }
  0x96   : > { %v367_v8 = vadd.f32 %v364_v7, %v342_v6 }
  0x98   : > { %1236 = vtanh.f32 %v367_v8  ;;  %v1163_v11 = vmul.f32 -1.442695, %v367_v8 }
  0x9a   : > { %1238 = vpow2.f32 %v1163_v11 }
  0x9e   : > { %v1237_v9 = vpop.eup %1236 }
  0x9f   : > { %394 = vrot.lane.b32.xlu0 %v1237_v9, %s1325_s30 }
  0xa0   : > { %v1239_v12 = vpop.eup %1238 }
  0xa1   : > { %v371_v13 = vadd.f32 1.0, %v1239_v12 }
  0xa3   : > { %1240 = vrcp.f32 %v371_v13  ;;  %v383_v19 = vand.u32 2147483648, %v371_v13  ;;  %vm377_vm2 = vweird.f32 %v371_v13  ;;  %v381_v20 = vand.u32 2147483647, %v371_v13 }
  0xa5   : > { %v384_v22 = vor.u32 1.1754944e-38, %v383_v19  ;;  %vm382_vm4 = vcmp.eq.f32.partialorder %v381_v20, 8.507059e+37 }
  0xa7   : > { %389 = vrot.lane.b32.xlu0 %v338_v10, %s1325_s30 }
  0xa9   : > { %v1241_v14 = vpop.eup %1240 }
  0xaa   : > { %v373_v15 = vmul.f32 %v1241_v14, %v371_v13  ;;  %vm378_vm1 = vweird.f32 %v1241_v14 }
  0xab   : > { %vm379_vm3 = vmor %vm377_vm2, %vm378_vm1 }
  0xac   : > { %v374_v16 = vsub.f32 1.0, %v373_v15 }
  0xae   : > { %v375_v17 = vmul.f32 %v1241_v14, %v374_v16 }
  0xb0   : > { %v376_v18 = vadd.f32 %v1241_v14, %v375_v17 }
  0xb2   : > { %v380_v21 = vsel %vm379_vm3, %v1241_v14, %v376_v18 }
  0xb3   : > { %v385_v24 = vsel %vm382_vm4, %v384_v22, %v380_v21  ;;  %v1177_v22 = vld [vmem:[%s1046_s22 + $0x18] sm:$0xff]  ;;  %s325_s22 = scalar_lea.vmem %s1527_s4, %s1159_s14 }
 0x111   : > { %v395_v23 = vpop.permute.xlu0 %394 }
 0x112   : > { %v397_v25 = vmul.f32 %v395_v23, %v385_v24 }
 0x114   : > { %399 = vrot.lane.b32.xlu1 %v397_v25, %s1325_s30 }
 0x119   : > { %v390_v26 = vpop.permute.xlu0 %389 }
 0x11a   : > { %v392_v27 = vmul.f32 %v390_v26, %v385_v24 }
 0x186   : > { %v400_v28 = vpop.permute.xlu1 %399 }
 0x187   : > { %v402_v29 = vadd.f32 %v400_v28, %v392_v27 }
 0x189   : > { %1242 = vtanh.f32 %v402_v29 }
 0x18f   : > { %v1243_v30 = vpop.eup %1242 }
 0x190   : > { %405 = vrot.lane.b32.xlu1 %v1243_v30, %s1325_s30 }
 0x202   : > { %v406_v31 = vpop.permute.xlu1 %405 }
 0x203   : > { %v408_v32 = vmul.f32 %v406_v31, %v385_v24 }
 0x205   : > { %410 = vrot.lane.b32.xlu2 %v408_v32, %s1326_s5 }
 0x25f   : > { %v411_v33 = vpop.permute.xlu2 %410 }
 0x260   : > { %414 = vst.msk [vmem:[%s413_s9] sm:$0xff] %vm330_vm0, %v411_v33  ;;  %1166 = vmatmul.msk.f32.vlgmr.msra.gmra.mxu1 %vm330_vm0, %v411_v33  ;;  %s1191_s9 = smul.u32 4294967256, %s1314_s15 }
 0x262   : > { %s1065_s10 = scalar_lea.vmem %s1391_s28, %s1191_s9  ;;  %s1069_s11 = scalar_lea.vmem %s1406_s8, %s1191_s9 }
 0x2dd   : > { %v439_v35 = vpop.f32.mrf.mxu1 }
 0x2de   : > { %v442_v36 = vadd.f32 %v1165_v34, %v439_v35 }
 0x2e0   : > { %1244 = vtanh.f32 %v442_v36  ;;  %v1167_v38 = vmul.f32 -1.442695, %v442_v36 }
 0x2e2   : > { %1246 = vpow2.f32 %v1167_v38 }
 0x2e6   : > { %v1245_v37 = vpop.eup %1244 }
 0x2e7   : > { %465 = vrot.lane.b32.xlu2 %v1245_v37, %s1325_s30 }
 0x2e8   : > { %v1247_v39 = vpop.eup %1246 }
 0x2e9   : > { %v446_v40 = vadd.f32 1.0, %v1247_v39 }
 0x2eb   : > { %1248 = vrcp.f32 %v446_v40  ;;  %v458_v46 = vand.u32 2147483648, %v446_v40  ;;  %vm452_vm6 = vweird.f32 %v446_v40  ;;  %v456_v47 = vand.u32 2147483647, %v446_v40 }
 0x2ed   : > { %v459_v49 = vor.u32 1.1754944e-38, %v458_v46  ;;  %vm457_vm8 = vcmp.eq.f32.partialorder %v456_v47, 8.507059e+37 }
 0x2f1   : > { %v1249_v41 = vpop.eup %1248 }
 0x2f2   : > { %v448_v42 = vmul.f32 %v1249_v41, %v446_v40  ;;  %vm453_vm5 = vweird.f32 %v1249_v41 }
 0x2f3   : > { %vm454_vm7 = vmor %vm452_vm6, %vm453_vm5 }
 0x2f4   : > { %v449_v43 = vsub.f32 1.0, %v448_v42 }
 0x2f6   : > { %v450_v44 = vmul.f32 %v1249_v41, %v449_v43 }
 0x2f8   : > { %v451_v45 = vadd.f32 %v1249_v41, %v450_v44 }
 0x2fa   : > { %v455_v48 = vsel %vm454_vm7, %v1249_v41, %v451_v45 }
 0x2fb   : > { %v460_v51 = vsel %vm457_vm8, %v459_v49, %v455_v48  ;;  %v630_v48 = vld [vmem:[%s629_s26] sm:$0xff] }
 0x2fc   : > { %v463_v53 = vmul.f32 %v460_v51, %v402_v29 }
 0x341   : > { %v466_v50 = vpop.permute.xlu2 %465 }
 0x342   : > { %v468_v52 = vmul.f32 %v466_v50, %v460_v51 }
 0x344   : > { %470 = vrot.lane.b32.xlu0 %v468_v52, %s1325_s30 }
 0x3b6   : > { %v471_v54 = vpop.permute.xlu0 %470 }
 0x3b7   : > { %v473_v55 = vadd.f32 %v471_v54, %v463_v53 }
 0x3b9   : > { %1250 = vtanh.f32 %v473_v55 }
 0x3bf   : > { %v1251_v56 = vpop.eup %1250 }
 0x3c0   : > { %476 = vrot.lane.b32.xlu1 %v1251_v56, %s1325_s30 }
 0x432   : > { %v477_v57 = vpop.permute.xlu1 %476 }
 0x433   : > { %v479_v58 = vmul.f32 %v477_v57, %v460_v51 }
 0x435   : > { %481 = vrot.lane.b32.xlu2 %v479_v58, %s1326_s5 }
 0x48f   : > { %v482_v59 = vpop.permute.xlu2 %481 }
 0x490   : > { %1169 = vst.msk [vmem:[%s1035_s12 + $0x8] sm:$0xff] %vm330_vm0, %v482_v59  ;;  %1172 = vmatmul.msk.f32.vlgmr.msra.gmra.mxu2 %vm330_vm0, %v482_v59  ;;  %s1197_s12 = smul.u32 4294967240, %s1314_s15 }
 0x492   : > { %s1073_s13 = scalar_lea.vmem %s1391_s28, %s1197_s12  ;;  %s1327_s28 = smov 96  }
 0x513   : > { %v510_v61 = vpop.f32.mrf.mxu2 }
 0x514   : > { %v513_v62 = vadd.f32 %v1171_v60, %v510_v61 }
 0x516   : > { %1252 = vtanh.f32 %v513_v62  ;;  %v1173_v0 = vmul.f32 -1.442695, %v513_v62 }
 0x518   : > { %1254 = vpow2.f32 %v1173_v0 }
 0x51c   : > { %v1253_v63 = vpop.eup %1252 }
 0x51d   : > { %536 = vrot.lane.b32.xlu0 %v1253_v63, %s1325_s30 }
 0x51e   : > { %v1255_v1 = vpop.eup %1254 }
 0x51f   : > { %v517_v2 = vadd.f32 1.0, %v1255_v1 }
 0x521   : > { %1256 = vrcp.f32 %v517_v2  ;;  %v529_v8 = vand.u32 2147483648, %v517_v2  ;;  %vm523_vm10 = vweird.f32 %v517_v2  ;;  %v527_v9 = vand.u32 2147483647, %v517_v2 }
 0x523   : > { %v530_v11 = vor.u32 1.1754944e-38, %v529_v8  ;;  %vm528_vm12 = vcmp.eq.f32.partialorder %v527_v9, 8.507059e+37 }
 0x527   : > { %v1257_v3 = vpop.eup %1256 }
 0x528   : > { %v519_v4 = vmul.f32 %v1257_v3, %v517_v2  ;;  %vm524_vm9 = vweird.f32 %v1257_v3 }
 0x529   : > { %vm525_vm11 = vmor %vm523_vm10, %vm524_vm9 }
 0x52a   : > { %v520_v5 = vsub.f32 1.0, %v519_v4 }
 0x52c   : > { %v521_v6 = vmul.f32 %v1257_v3, %v520_v5 }
 0x52e   : > { %v522_v7 = vadd.f32 %v1257_v3, %v521_v6 }
 0x530   : > { %v526_v10 = vsel %vm525_vm11, %v1257_v3, %v522_v7 }
 0x531   : > { %v531_v13 = vsel %vm528_vm12, %v530_v11, %v526_v10  ;;  %v1186_v10 = vld [vmem:[%s1057_s6 + $0x28] sm:$0xff] }
 0x532   : > { %v534_v15 = vmul.f32 %v531_v13, %v473_v55 }
 0x58f   : > { %v537_v12 = vpop.permute.xlu0 %536 }
 0x590   : > { %v539_v14 = vmul.f32 %v537_v12, %v531_v13 }
 0x592   : > { %541 = vrot.lane.b32.xlu1 %v539_v14, %s1325_s30 }
 0x604   : > { %v542_v16 = vpop.permute.xlu1 %541 }
 0x605   : > { %v544_v17 = vadd.f32 %v542_v16, %v534_v15 }
 0x607   : > { %1258 = vtanh.f32 %v544_v17 }
 0x60d   : > { %v1259_v18 = vpop.eup %1258 }
 0x60e   : > { %547 = vrot.lane.b32.xlu2 %v1259_v18, %s1325_s30 }
 0x668   : > { %v548_v19 = vpop.permute.xlu2 %547 }
 0x669   : > { %v550_v20 = vmul.f32 %v548_v19, %v531_v13 }
 0x66b   : > { %552 = vrot.lane.b32.xlu0 %v550_v20, %s1326_s5 }
 0x6dd   : > { %v553_v21 = vpop.permute.xlu0 %552 }
 0x6de   : > { %1175 = vst.msk [vmem:[%s1043_s20 + $0x10] sm:$0xff] %vm330_vm0, %v553_v21  ;;  %1178 = vmatmul.msk.f32.vlgmr.msra.gmra.mxu3 %vm330_vm0, %v553_v21 }
 0x761   : > { %v580_v23 = vpop.f32.mrf.mxu3 }
 0x762   : > { %v583_v24 = vadd.f32 %v1177_v22, %v580_v23 }
 0x764   : > { %1260 = vtanh.f32 %v583_v24  ;;  %v1179_v26 = vmul.f32 -1.442695, %v583_v24 }
 0x766   : > { %1262 = vpow2.f32 %v1179_v26 }
 0x76a   : > { %v1261_v25 = vpop.eup %1260 }
 0x76b   : > { %606 = vrot.lane.b32.xlu1 %v1261_v25, %s1325_s30 }
 0x76c   : > { %v1263_v27 = vpop.eup %1262 }
 0x76d   : > { %v587_v28 = vadd.f32 1.0, %v1263_v27 }
 0x76f   : > { %1264 = vrcp.f32 %v587_v28  ;;  %v599_v34 = vand.u32 2147483648, %v587_v28  ;;  %vm593_vm14 = vweird.f32 %v587_v28  ;;  %v597_v35 = vand.u32 2147483647, %v587_v28 }
 0x771   : > { %v600_v37 = vor.u32 1.1754944e-38, %v599_v34  ;;  %vm598_vm1 = vcmp.eq.f32.partialorder %v597_v35, 8.507059e+37 }
 0x775   : > { %v1265_v29 = vpop.eup %1264 }
 0x776   : > { %v589_v30 = vmul.f32 %v1265_v29, %v587_v28  ;;  %vm594_vm13 = vweird.f32 %v1265_v29 }
 0x777   : > { %vm595_vm15 = vmor %vm593_vm14, %vm594_vm13 }
 0x778   : > { %v590_v31 = vsub.f32 1.0, %v589_v30 }
 0x77a   : > { %v591_v32 = vmul.f32 %v1265_v29, %v590_v31 }
 0x77c   : > { %v592_v33 = vadd.f32 %v1265_v29, %v591_v32 }
 0x77e   : > { %v596_v36 = vsel %vm595_vm15, %v1265_v29, %v592_v33 }
 0x77f   : > { %v601_v39 = vsel %vm598_vm1, %v600_v37, %v596_v36  ;;  %v1192_v36 = vld [vmem:[%s1065_s10 + $0x30] sm:$0xff] }
 0x780   : > { %v604_v41 = vmul.f32 %v601_v39, %v544_v17 }
 0x7dd   : > { %v607_v38 = vpop.permute.xlu1 %606 }
 0x7de   : > { %v609_v40 = vmul.f32 %v607_v38, %v601_v39 }
 0x7e0   : > { %611 = vrot.lane.b32.xlu2 %v609_v40, %s1325_s30 }
 0x83a   : > { %v612_v42 = vpop.permute.xlu2 %611 }
 0x83b   : > { %v614_v43 = vadd.f32 %v612_v42, %v604_v41 }
 0x83d   : > { %1266 = vtanh.f32 %v614_v43 }
 0x843   : > { %v1267_v44 = vpop.eup %1266 }
 0x844   : > { %617 = vrot.lane.b32.xlu0 %v1267_v44, %s1325_s30 }
 0x8b6   : > { %v618_v45 = vpop.permute.xlu0 %617 }
 0x8b7   : > { %v620_v46 = vmul.f32 %v618_v45, %v601_v39 }
 0x8b9   : > { %622 = vrot.lane.b32.xlu1 %v620_v46, %s1326_s5 }
 0x92b   : > { %v623_v47 = vpop.permute.xlu1 %622 }
 0x92c   : > { %1181 = vst.msk [vmem:[%s1049_s23 + $0x18] sm:$0xff] %vm330_vm0, %v623_v47  ;;  %1183 = vmatmul.msk.f32.vlgmr.msrb.gmra.mxu0 %vm330_vm0, %v623_v47  ;;  %s1077_s23 = scalar_lea.vmem %s1406_s8, %s1197_s12 }
 0x9a9   : > { %v650_v49 = vpop.f32.mrf.mxu0 }
 0x9aa   : > { %v653_v50 = vadd.f32 %v650_v49, %v630_v48 }
 0x9ac   : > { %1268 = vtanh.f32 %v653_v50  ;;  %v1184_v52 = vmul.f32 -1.442695, %v653_v50 }
 0x9ae   : > { %1270 = vpow2.f32 %v1184_v52 }
 0x9b2   : > { %v1269_v51 = vpop.eup %1268 }
 0x9b3   : > { %676 = vrot.lane.b32.xlu2 %v1269_v51, %s1325_s30 }
 0x9b4   : > { %v1271_v53 = vpop.eup %1270 }
 0x9b5   : > { %v657_v54 = vadd.f32 1.0, %v1271_v53 }
 0x9b7   : > { %1272 = vrcp.f32 %v657_v54  ;;  %v669_v60 = vand.u32 2147483648, %v657_v54  ;;  %vm663_vm3 = vweird.f32 %v657_v54  ;;  %v667_v61 = vand.u32 2147483647, %v657_v54 }
 0x9b9   : > { %v670_v63 = vor.u32 1.1754944e-38, %v669_v60  ;;  %vm668_vm5 = vcmp.eq.f32.partialorder %v667_v61, 8.507059e+37 }
 0x9bd   : > { %v1273_v55 = vpop.eup %1272 }
 0x9be   : > { %v659_v56 = vmul.f32 %v1273_v55, %v657_v54  ;;  %vm664_vm2 = vweird.f32 %v1273_v55 }
 0x9bf   : > { %vm665_vm4 = vmor %vm663_vm3, %vm664_vm2 }
 0x9c0   : > { %v660_v57 = vsub.f32 1.0, %v659_v56 }
 0x9c2   : > { %v661_v58 = vmul.f32 %v1273_v55, %v660_v57 }
 0x9c4   : > { %v662_v59 = vadd.f32 %v1273_v55, %v661_v58 }
 0x9c6   : > { %v666_v62 = vsel %vm665_vm4, %v1273_v55, %v662_v59 }
 0x9c7   : > { %v671_v1 = vsel %vm668_vm5, %v670_v63, %v666_v62  ;;  %v1198_v62 = vld [vmem:[%s1073_s13 + $0x38] sm:$0xff] }
 0x9c8   : > { %v674_v3 = vmul.f32 %v671_v1, %v614_v43 }
 0xa0d   : > { %v677_v0 = vpop.permute.xlu2 %676 }
 0xa0e   : > { %v679_v2 = vmul.f32 %v677_v0, %v671_v1 }
 0xa10   : > { %681 = vrot.lane.b32.xlu0 %v679_v2, %s1325_s30 }
 0xa82   : > { %v682_v4 = vpop.permute.xlu0 %681 }
 0xa83   : > { %v684_v5 = vadd.f32 %v682_v4, %v674_v3 }
 0xa85   : > { %1274 = vtanh.f32 %v684_v5 }
 0xa8b   : > { %v1275_v6 = vpop.eup %1274 }
 0xa8c   : > { %687 = vrot.lane.b32.xlu1 %v1275_v6, %s1325_s30 }
 0xafe   : > { %v688_v7 = vpop.permute.xlu1 %687 }
 0xaff   : > { %v690_v8 = vmul.f32 %v688_v7, %v671_v1 }
 0xb01   : > { %692 = vrot.lane.b32.xlu2 %v690_v8, %s1326_s5 }
 0xb5b   : > { %v693_v9 = vpop.permute.xlu2 %692 }
 0xb5c   : > { %696 = vst.msk [vmem:[%s695_s27] sm:$0xff] %vm330_vm0, %v693_v9  ;;  %1187 = vmatmul.msk.f32.vlgmr.msrb.gmra.mxu1 %vm330_vm0, %v693_v9 }
 0xbd9   : > { %v721_v11 = vpop.f32.mrf.mxu1 }
 0xbda   : > { %v724_v12 = vadd.f32 %v1186_v10, %v721_v11 }
 0xbdc   : > { %1276 = vtanh.f32 %v724_v12  ;;  %v1188_v14 = vmul.f32 -1.442695, %v724_v12 }
 0xbde   : > { %1278 = vpow2.f32 %v1188_v14 }
 0xbe2   : > { %v1277_v13 = vpop.eup %1276 }
 0xbe3   : > { %747 = vrot.lane.b32.xlu0 %v1277_v13, %s1325_s30 }
 0xbe4   : > { %v1279_v15 = vpop.eup %1278 }
 0xbe5   : > { %v728_v16 = vadd.f32 1.0, %v1279_v15 }
 0xbe7   : > { %1280 = vrcp.f32 %v728_v16  ;;  %v740_v22 = vand.u32 2147483648, %v728_v16  ;;  %vm734_vm7 = vweird.f32 %v728_v16  ;;  %v738_v23 = vand.u32 2147483647, %v728_v16 }
 0xbe9   : > { %v741_v25 = vor.u32 1.1754944e-38, %v740_v22  ;;  %vm739_vm9 = vcmp.eq.f32.partialorder %v738_v23, 8.507059e+37 }
 0xbed   : > { %v1281_v17 = vpop.eup %1280 }
 0xbee   : > { %v730_v18 = vmul.f32 %v1281_v17, %v728_v16  ;;  %vm735_vm6 = vweird.f32 %v1281_v17 }
 0xbef   : > { %vm736_vm8 = vmor %vm734_vm7, %vm735_vm6 }
 0xbf0   : > { %v731_v19 = vsub.f32 1.0, %v730_v18 }
 0xbf2   : > { %v732_v20 = vmul.f32 %v1281_v17, %v731_v19 }
 0xbf4   : > { %v733_v21 = vadd.f32 %v1281_v17, %v732_v20 }
 0xbf6   : > { %v737_v24 = vsel %vm736_vm8, %v1281_v17, %v733_v21 }
 0xbf7   : > { %v742_v27 = vsel %vm739_vm9, %v741_v25, %v737_v24 }
 0xbf8   : > { %v745_v29 = vmul.f32 %v742_v27, %v684_v5 }
 0xc55   : > { %v748_v26 = vpop.permute.xlu0 %747 }
 0xc56   : > { %v750_v28 = vmul.f32 %v748_v26, %v742_v27 }
 0xc58   : > { %752 = vrot.lane.b32.xlu1 %v750_v28, %s1325_s30 }
 0xcca   : > { %v753_v30 = vpop.permute.xlu1 %752 }
 0xccb   : > { %v755_v31 = vadd.f32 %v753_v30, %v745_v29 }
 0xccd   : > { %1282 = vtanh.f32 %v755_v31 }
 0xcd3   : > { %v1283_v32 = vpop.eup %1282 }
 0xcd4   : > { %758 = vrot.lane.b32.xlu2 %v1283_v32, %s1325_s30 }
 0xd2e   : > { %v759_v33 = vpop.permute.xlu2 %758 }
 0xd2f   : > { %v761_v34 = vmul.f32 %v759_v33, %v742_v27 }
 0xd31   : > { %763 = vrot.lane.b32.xlu0 %v761_v34, %s1326_s5 }
 0xda3   : > { %v764_v35 = vpop.permute.xlu0 %763 }
 0xda4   : > { %1190 = vst.msk [vmem:[%s1061_s7 + $0x28] sm:$0xff] %vm330_vm0, %v764_v35  ;;  %1193 = vmatmul.msk.f32.vlgmr.msrb.gmra.mxu2 %vm330_vm0, %v764_v35 }
 0xe27   : > { %v792_v37 = vpop.f32.mrf.mxu2 }
 0xe28   : > { %v795_v38 = vadd.f32 %v1192_v36, %v792_v37 }
 0xe2a   : > { %1284 = vtanh.f32 %v795_v38  ;;  %v1194_v40 = vmul.f32 -1.442695, %v795_v38 }
 0xe2c   : > { %1286 = vpow2.f32 %v1194_v40 }
 0xe30   : > { %v1285_v39 = vpop.eup %1284 }
 0xe31   : > { %818 = vrot.lane.b32.xlu1 %v1285_v39, %s1325_s30 }
 0xe32   : > { %v1287_v41 = vpop.eup %1286 }
 0xe33   : > { %v799_v42 = vadd.f32 1.0, %v1287_v41 }
 0xe35   : > { %1288 = vrcp.f32 %v799_v42  ;;  %v811_v48 = vand.u32 2147483648, %v799_v42  ;;  %vm805_vm11 = vweird.f32 %v799_v42  ;;  %v809_v49 = vand.u32 2147483647, %v799_v42 }
 0xe37   : > { %v812_v51 = vor.u32 1.1754944e-38, %v811_v48  ;;  %vm810_vm13 = vcmp.eq.f32.partialorder %v809_v49, 8.507059e+37 }
 0xe3b   : > { %v1289_v43 = vpop.eup %1288 }
 0xe3c   : > { %v801_v44 = vmul.f32 %v1289_v43, %v799_v42  ;;  %vm806_vm10 = vweird.f32 %v1289_v43 }
 0xe3d   : > { %vm807_vm12 = vmor %vm805_vm11, %vm806_vm10 }
 0xe3e   : > { %v802_v45 = vsub.f32 1.0, %v801_v44 }
 0xe40   : > { %v803_v46 = vmul.f32 %v1289_v43, %v802_v45 }
 0xe42   : > { %v804_v47 = vadd.f32 %v1289_v43, %v803_v46 }
 0xe44   : > { %v808_v50 = vsel %vm807_vm12, %v1289_v43, %v804_v47 }
 0xe45   : > { %v813_v53 = vsel %vm810_vm13, %v812_v51, %v808_v50 }
 0xe46   : > { %v816_v55 = vmul.f32 %v813_v53, %v755_v31 }
 0xea3   : > { %v819_v52 = vpop.permute.xlu1 %818 }
 0xea4   : > { %v821_v54 = vmul.f32 %v819_v52, %v813_v53 }
 0xea6   : > { %823 = vrot.lane.b32.xlu2 %v821_v54, %s1325_s30 }
 0xf00   : > { %v824_v56 = vpop.permute.xlu2 %823 }
 0xf01   : > { %v826_v57 = vadd.f32 %v824_v56, %v816_v55 }
 0xf03   : > { %1290 = vtanh.f32 %v826_v57 }
 0xf09   : > { %v1291_v58 = vpop.eup %1290 }
 0xf0a   : > { %829 = vrot.lane.b32.xlu0 %v1291_v58, %s1325_s30 }
 0xf7c   : > { %v830_v59 = vpop.permute.xlu0 %829 }
 0xf7d   : > { %v832_v60 = vmul.f32 %v830_v59, %v813_v53 }
 0xf7f   : > { %834 = vrot.lane.b32.xlu1 %v832_v60, %s1326_s5 }
 0xff1   : > { %v835_v61 = vpop.permute.xlu1 %834 }
 0xff2   : > { %1196 = vst.msk [vmem:[%s1069_s11 + $0x30] sm:$0xff] %vm330_vm0, %v835_v61  ;;  %1199 = vmatmul.msk.f32.vlgmr.msrb.gmra.mxu3 %vm330_vm0, %v835_v61 }
0x1075   : > { %v863_v63 = vpop.f32.mrf.mxu3 }
0x1076   : > { %v866_v0 = vadd.f32 %v1198_v62, %v863_v63 }
0x1078   : > { %1292 = vtanh.f32 %v866_v0  ;;  %v1200_v2 = vmul.f32 -1.442695, %v866_v0 }
0x107a   : > { %1294 = vpow2.f32 %v1200_v2 }
0x107e   : > { %v1293_v1 = vpop.eup %1292 }
0x107f   : > { %889 = vrot.lane.b32.xlu2 %v1293_v1, %s1325_s30 }
0x1080   : > { %v1295_v3 = vpop.eup %1294 }
0x1081   : > { %v870_v4 = vadd.f32 1.0, %v1295_v3 }
0x1083   : > { %1296 = vrcp.f32 %v870_v4  ;;  %v882_v10 = vand.u32 2147483648, %v870_v4  ;;  %vm876_vm15 = vweird.f32 %v870_v4  ;;  %v880_v11 = vand.u32 2147483647, %v870_v4 }
0x1085   : > { %v883_v13 = vor.u32 1.1754944e-38, %v882_v10  ;;  %vm881_vm2 = vcmp.eq.f32.partialorder %v880_v11, 8.507059e+37 }
0x1089   : > { %v1297_v5 = vpop.eup %1296 }
0x108a   : > { %v872_v6 = vmul.f32 %v1297_v5, %v870_v4  ;;  %vm877_vm14 = vweird.f32 %v1297_v5 }
0x108b   : > { %vm878_vm1 = vmor %vm876_vm15, %vm877_vm14 }
0x108c   : > { %v873_v7 = vsub.f32 1.0, %v872_v6 }
0x108e   : > { %v874_v8 = vmul.f32 %v1297_v5, %v873_v7 }
0x1090   : > { %v875_v9 = vadd.f32 %v1297_v5, %v874_v8 }
0x1092   : > { %v879_v12 = vsel %vm878_vm1, %v1297_v5, %v875_v9 }
0x1093   : > { %v884_v15 = vsel %vm881_vm2, %v883_v13, %v879_v12 }
0x1094   : > { %v887_v17 = vmul.f32 %v884_v15, %v826_v57 }
0x10d9   : > { %v890_v14 = vpop.permute.xlu2 %889 }
0x10da   : > { %v892_v16 = vmul.f32 %v890_v14, %v884_v15 }
0x10dc   : > { %894 = vrot.lane.b32.xlu0 %v892_v16, %s1325_s30 }
0x114e   : > { %v895_v18 = vpop.permute.xlu0 %894 }
0x114f   : > { %v897_v19 = vadd.f32 %v895_v18, %v887_v17 }
0x1151   : > { %1298 = vtanh.f32 %v897_v19  ;;  %912 = vrot.lane.b32.xlu0 %v897_v19, %s1327_s28 }
0x1157   : > { %v1299_v20 = vpop.eup %1298 }
0x1158   : > { %900 = vrot.lane.b32.xlu1 %v1299_v20, %s1325_s30  ;;  %s321_s30 = scalar_lea.vmem %s1526_s3, %s1159_s14 }
0x11c3   : > { %v913_v21 = vpop.permute.xlu0 %912 }
0x11c4   : > { %915 = vst.msk [vmem:[#allocation3] sm:$0xff] %vm330_vm0, %v913_v21 }
0x11c5   : > { %920 = vst.msk [vmem:[%s325_s22] sm:$0xff] %vm330_vm0, %v913_v21 }
0x11ca   : > { %v901_v22 = vpop.permute.xlu1 %900 }
0x11cb   : > { %v903_v23 = vmul.f32 %v901_v22, %v884_v15 }
0x11cd   : > { %905 = vrot.lane.b32.xlu2 %v903_v23, %s1326_s5 }
0x1227   : > { %v906_v24 = vpop.permute.xlu2 %905 }
0x1228   : > { %1202 = vst.msk [vmem:[%s1077_s23 + $0x38] sm:$0xff] %vm330_vm0, %v906_v24 }
0x1229   : > { %910 = vst.msk [vmem:[#allocation2] sm:$0xff] %vm330_vm0, %v906_v24 }
0x122a   : > { %919 = vst.msk [vmem:[%s321_s30] sm:$0xff] %vm330_vm0, %v906_v24 }
0x122b PF: > { %s15_s17 = sadd.s32 1, %s1322_s17   ;;  %s1528_s15 = smov %s1318_s16 }
0x122c   : > { %p12_p5 = scmp.ge.s32.totalorder %s15_s17, 4   ;;  %s1529_s16 = smov %s1531_s18 }
0x122e   :  { %14 = sbr.rel (!%p12_p5) target bundleno = 2 (0x2), region = 109 }

</bundles_post_ra>
